<compile_context>
chip_gen: v5e
topology: v5e:2x2
jax: 0.10.0
libtpu: 0.0.40
codegen_flags: <defaults>
</compile_context>

<pallas_src>
import functools

import jax
import jax.numpy as jnp
from jax.experimental import pallas as pl
from jax.experimental.pallas import tpu as pltpu


_ACT_DTYPE = jnp.bfloat16   # activation / weight carry dtype (f32 accumulation)
_LN_EPS = 1e-5
_VMEM = pl.BlockSpec(memory_space=pltpu.MemorySpace.VMEM)


def _pick_tile(dim, target, align):
    """Largest tile <= target that is a multiple of `align` and divides `dim`;
    falls back to the full dim (always legal for BlockSpec)."""
    if dim <= target:
        return dim
    t = (target // align) * align
    while t >= align:
        if dim % t == 0:
            return t
        t -= align
    return dim


# ----------------------------------------------------------------------------
# Fused LN -> matmul -> bias -> GELU -> +residual kernel
# ----------------------------------------------------------------------------

def _ln_linear_kernel(*refs, has_ln, has_bias, has_res, activation):
    it = iter(refs)
    x_ref = next(it)
    if has_ln:
        g_ref = next(it)
        bln_ref = next(it)
    w_ref = next(it)
    if has_bias:
        b_ref = next(it)
    if has_res:
        r_ref = next(it)
    o_ref = next(it)

    w = w_ref[...]
    x = x_ref[...]
    if has_ln:
        xf = x.astype(jnp.float32)
        mu = jnp.mean(xf, axis=-1, keepdims=True)
        xc = xf - mu
        var = jnp.mean(xc * xc, axis=-1, keepdims=True)
        xf = xc * jax.lax.rsqrt(var + _LN_EPS) * g_ref[...].astype(jnp.float32) \
            + bln_ref[...].astype(jnp.float32)
        x = xf.astype(w.dtype)
    else:
        x = x.astype(w.dtype)

    y = jnp.dot(x, w, preferred_element_type=jnp.float32)
    if has_bias:
        y = y + b_ref[...].astype(jnp.float32)
    if activation == "gelu":
        y = jax.nn.gelu(y, approximate=False)      # matches torch.nn.GELU (erf)
    if has_res:
        y = y + r_ref[...].astype(jnp.float32)
    o_ref[...] = y.astype(o_ref.dtype)


def ln_linear(x, w, b=None, ln=None, residual=None, activation=None,
              tm_target=256, tn_target=256):
    """y = [LN(x)] @ w [+ b] [GELU] [+ residual].  x:(M,K) w:(K,N) -> (M,N) bf16.

    Tiled over (M, N); K kept whole per block so the LN prologue can be fused.
    """
    M, K = x.shape
    N = w.shape[1]
    tm = _pick_tile(M, tm_target, 8)
    tn = _pick_tile(N, tn_target, 128)
    grid = (M // tm, N // tn)

    in_specs = [pl.BlockSpec((tm, K), lambda i, j: (i, 0))]
    args = [x]
    has_ln = ln is not None
    if has_ln:
        g, bln = ln
        in_specs += [pl.BlockSpec((1, K), lambda i, j: (0, 0)),
                     pl.BlockSpec((1, K), lambda i, j: (0, 0))]
        args += [g.reshape(1, K).astype(jnp.float32),
                 bln.reshape(1, K).astype(jnp.float32)]
    in_specs.append(pl.BlockSpec((K, tn), lambda i, j: (0, j)))
    args.append(w)
    has_bias = b is not None
    if has_bias:
        in_specs.append(pl.BlockSpec((1, tn), lambda i, j: (0, j)))
        args.append(b.reshape(1, N).astype(jnp.float32))
    has_res = residual is not None
    if has_res:
        in_specs.append(pl.BlockSpec((tm, tn), lambda i, j: (i, j)))
        args.append(residual)

    kernel = functools.partial(_ln_linear_kernel, has_ln=has_ln,
                               has_bias=has_bias, has_res=has_res,
                               activation=activation)
    return pl.pallas_call(
        kernel,
        grid=grid,
        in_specs=in_specs,
        out_specs=pl.BlockSpec((tm, tn), lambda i, j: (i, j)),
        out_shape=jax.ShapeDtypeStruct((M, N), _ACT_DTYPE),
        compiler_params=pltpu.CompilerParams(
            dimension_semantics=("parallel", "parallel")),
    )(*args)


# ----------------------------------------------------------------------------
# Standalone LayerNorm (only used for the vision ln_pre)
# ----------------------------------------------------------------------------

def _layernorm_kernel(x_ref, g_ref, b_ref, o_ref):
    x = x_ref[...].astype(jnp.float32)
    mu = jnp.mean(x, axis=-1, keepdims=True)
    xc = x - mu
    var = jnp.mean(xc * xc, axis=-1, keepdims=True)
    o_ref[...] = (xc * jax.lax.rsqrt(var + _LN_EPS) * g_ref[...]
                  + b_ref[...]).astype(o_ref.dtype)


def layernorm(x, g, b, tm_target=512):
    M, D = x.shape
    tm = _pick_tile(M, tm_target, 8)
    return pl.pallas_call(
        _layernorm_kernel,
        grid=(M // tm,),
        in_specs=[pl.BlockSpec((tm, D), lambda i: (i, 0)),
                  pl.BlockSpec((1, D), lambda i: (0, 0)),
                  pl.BlockSpec((1, D), lambda i: (0, 0))],
        out_specs=pl.BlockSpec((tm, D), lambda i: (i, 0)),
        out_shape=jax.ShapeDtypeStruct((M, D), _ACT_DTYPE),
        compiler_params=pltpu.CompilerParams(dimension_semantics=("parallel",)),
    )(x, g.reshape(1, D).astype(jnp.float32), b.reshape(1, D).astype(jnp.float32))


# ----------------------------------------------------------------------------
# Attention: packed QKV in, all heads per grid step, in-kernel causal mask
# ----------------------------------------------------------------------------

def _attention_kernel(qkv_ref, o_ref, *, heads, causal, scale):
    L = qkv_ref.shape[1]
    W = qkv_ref.shape[2] // 3
    Dh = W // heads
    qkv = qkv_ref[0]                                    # (L, 3W) bf16

    if causal:
        row = jax.lax.broadcasted_iota(jnp.int32, (L, L), 0)
        col = jax.lax.broadcasted_iota(jnp.int32, (L, L), 1)
        neg = jnp.where(col > row, -jnp.inf, 0.0).astype(jnp.float32)

    for h in range(heads):                              # static unroll over heads
        qh = qkv[:, h * Dh:(h + 1) * Dh] * scale        # fold 1/sqrt(Dh) into q
        kh = qkv[:, W + h * Dh:W + (h + 1) * Dh]
        vh = qkv[:, 2 * W + h * Dh:2 * W + (h + 1) * Dh]
        s = jnp.einsum('qd,kd->qk', qh, kh, preferred_element_type=jnp.float32)
        if causal:
            s = s + neg
        s = s - jnp.max(s, axis=-1, keepdims=True)
        p = jnp.exp(s)
        p = p * pl.reciprocal(jnp.sum(p, axis=-1, keepdims=True), approx=True)
        oh = jnp.dot(p.astype(qkv.dtype), vh, preferred_element_type=jnp.float32)
        o_ref[0, :, h * Dh:(h + 1) * Dh] = oh.astype(o_ref.dtype)


def attention(qkv, heads, causal):
    """softmax(q k^T / sqrt(Dh) [+ causal]) v over all heads.
    qkv:(B,L,3W) packed [q|k|v] -> (B,L,W) in head-concatenated layout."""
    B, L, W3 = qkv.shape
    W = W3 // 3
    Dh = W // heads
    scale = 1.0 / float(Dh) ** 0.5
    return pl.pallas_call(
        functools.partial(_attention_kernel, heads=heads, causal=causal,
                          scale=scale),
        grid=(B,),
        in_specs=[pl.BlockSpec((1, L, W3), lambda b: (b, 0, 0))],
        out_specs=pl.BlockSpec((1, L, W), lambda b: (b, 0, 0)),
        out_shape=jax.ShapeDtypeStruct((B, L, W), _ACT_DTYPE),
        compiler_params=pltpu.CompilerParams(dimension_semantics=("parallel",)),
    )(qkv)


# ----------------------------------------------------------------------------
# Fused pooled head: LayerNorm -> projection -> L2 normalize (on (B, W) rows)
# ----------------------------------------------------------------------------

def _head_kernel(x_ref, g_ref, b_ref, w_ref, o_ref):
    x = x_ref[...].astype(jnp.float32)
    mu = jnp.mean(x, axis=-1, keepdims=True)
    xc = x - mu
    var = jnp.mean(xc * xc, axis=-1, keepdims=True)
    y = xc * jax.lax.rsqrt(var + _LN_EPS) * g_ref[...] + b_ref[...]
    z = jnp.dot(y, w_ref[...], preferred_element_type=jnp.float32)
    n = jnp.sqrt(jnp.sum(z * z, axis=-1, keepdims=True))
    o_ref[...] = (z / jnp.maximum(n, 1e-12)).astype(o_ref.dtype)   # F.normalize eps


def pooled_head(pooled, g, b, proj):
    B, W = pooled.shape
    E = proj.shape[1]
    return pl.pallas_call(
        _head_kernel,
        in_specs=[_VMEM, _VMEM, _VMEM, _VMEM],
        out_specs=_VMEM,
        out_shape=jax.ShapeDtypeStruct((B, E), jnp.float32),
    )(pooled, g.reshape(1, W).astype(jnp.float32),
      b.reshape(1, W).astype(jnp.float32), proj.astype(jnp.float32))


# ----------------------------------------------------------------------------
# Transformer block (pre-LN, exact GELU)
# ----------------------------------------------------------------------------

def residual_block(x2d, p, heads, causal, B, L):
    """x += attn(ln1(x)); x += mlp(ln2(x)).  x2d:(B*L, W) bf16."""
    W = x2d.shape[1]
    a = p["attn"]
    # LN1 + fused QKV projection  -> packed (B, L, 3W)
    qkv = ln_linear(x2d, a["in_w"], a["in_b"], ln=(p["ln1_g"], p["ln1_b"]))
    attn_out = attention(qkv.reshape(B, L, 3 * W), heads, causal)   # (B, L, W)
    # out-proj with fused residual add
    x2d = ln_linear(attn_out.reshape(B * L, W), a["out_w"], a["out_b"],
                    residual=x2d)
    # LN2 + MLP fc + exact GELU
    h = ln_linear(x2d, p["fc_w"], p["fc_b"], ln=(p["ln2_g"], p["ln2_b"]),
                  activation="gelu")
    # MLP proj with fused residual add
    x2d = ln_linear(h, p["proj_w"], p["proj_b"], residual=x2d)
    return x2d


# ----------------------------------------------------------------------------
# Towers
# ----------------------------------------------------------------------------

def vision_forward(image, p, cfg):
    """VisionTransformer: patch embed -> cls tok -> pos -> ln_pre -> blocks
       -> 'tok' pool -> (ln_post + proj + L2-norm fused)."""
    B, C, H, Wimg = image.shape
    ps = cfg["patch_size"]
    gh, gw = H // ps, Wimg // ps
    npatch = gh * gw
    width = cfg["width"]
    L = npatch + 1

    # conv1(kernel=stride=patch, bias=False) == matmul over flattened patches
    patches = image.reshape(B, C, gh, ps, gw, ps).transpose(0, 2, 4, 1, 3, 5)
    patches = patches.reshape(B * npatch, C * ps * ps).astype(_ACT_DTYPE)
    x = ln_linear(patches, p["patch_w"])                # bias-free kernel variant
    x = x.reshape(B, npatch, width).astype(jnp.float32)

    cls = jnp.broadcast_to(p["class_emb"].reshape(1, 1, width), (B, 1, width))
    x = jnp.concatenate([cls, x], axis=1) + p["pos_emb"][None, :, :]
    x2d = layernorm(x.reshape(B * L, width).astype(_ACT_DTYPE),
                    p["ln_pre_g"], p["ln_pre_b"])

    for blk in p["blocks"]:
        x2d = residual_block(x2d, blk, cfg["heads"], False, B, L)

    # pool_type='tok'; ln_post is row-wise so pooling first is exact
    pooled = x2d.reshape(B, L, width)[:, 0]
    return pooled_head(pooled, p["ln_post_g"], p["ln_post_b"], p["proj"])


def text_forward(text, p, cfg):
    """TextTransformer: tok embed -> pos -> causal blocks -> 'argmax' (EOT) pool
       -> (ln_final + proj + L2-norm fused)."""
    B, L = text.shape
    width = cfg["width"]

    x = jnp.take(p["tok_emb"], text, axis=0) + p["pos_emb"][:L][None, :, :]
    x2d = x.reshape(B * L, width).astype(_ACT_DTYPE)

    for blk in p["blocks"]:
        x2d = residual_block(x2d, blk, cfg["heads"], True, B, L)

    eot = jnp.argmax(text, axis=-1)                     # pool_type='argmax'
    pooled = x2d.reshape(B, L, width)[jnp.arange(B), eot]
    return pooled_head(pooled, p["ln_f_g"], p["ln_f_b"], p["proj"])


def custom_text_clip_forward(image, text, params):
    img_feat = vision_forward(image, params["visual"], params["vision_cfg"])
    txt_feat = text_forward(text, params["text"], params["text_cfg"])
    logit_scale = jnp.exp(params["logit_scale"])
    return img_feat, txt_feat, logit_scale
    # TODO(synk): init_logit_bias is None in this config, so no logit_bias output.


# ----------------------------------------------------------------------------
# Deterministic parameter init (matmul weights stored bf16, LN/bias/proj f32)
# ----------------------------------------------------------------------------

def _nrm(key, shape, std=0.02, dtype=jnp.float32):
    return (jax.random.normal(key, shape, jnp.float32) * std).astype(dtype)


def _init_block(key, width, mlp_hidden):
    ks = jax.random.split(key, 6)
    return {
        "ln1_g": jnp.ones((width,), jnp.float32),
        "ln1_b": jnp.zeros((width,), jnp.float32),
        "attn": {
            "in_w": _nrm(ks[0], (width, 3 * width), dtype=_ACT_DTYPE),
            "in_b": jnp.zeros((3 * width,), jnp.float32),
            "out_w": _nrm(ks[1], (width, width), dtype=_ACT_DTYPE),
            "out_b": jnp.zeros((width,), jnp.float32),
        },
        "ln2_g": jnp.ones((width,), jnp.float32),
        "ln2_b": jnp.zeros((width,), jnp.float32),
        "fc_w": _nrm(ks[2], (width, mlp_hidden), dtype=_ACT_DTYPE),
        "fc_b": jnp.zeros((mlp_hidden,), jnp.float32),
        "proj_w": _nrm(ks[3], (mlp_hidden, width), dtype=_ACT_DTYPE),
        "proj_b": jnp.zeros((width,), jnp.float32),
    }


def init_params(key, embed_dim, vision_cfg, text_cfg):
    kv, kt, _ = jax.random.split(key, 3)

    vw, vp = vision_cfg["width"], vision_cfg["patch_size"]
    gh = vision_cfg["image_size"] // vp
    v_len = gh * gh + 1
    kvs = jax.random.split(kv, 5 + vision_cfg["layers"])
    visual = {
        "patch_w": _nrm(kvs[0], (3 * vp * vp, vw), dtype=_ACT_DTYPE),
        "class_emb": _nrm(kvs[1], (vw,), std=vw ** -0.5),
        "pos_emb": _nrm(kvs[2], (v_len, vw), std=vw ** -0.5),
        "ln_pre_g": jnp.ones((vw,), jnp.float32),
        "ln_pre_b": jnp.zeros((vw,), jnp.float32),
        "blocks": [
            _init_block(kvs[5 + i], vw, int(vw * vision_cfg["mlp_ratio"]))
            for i in range(vision_cfg["layers"])
        ],
        "ln_post_g": jnp.ones((vw,), jnp.float32),
        "ln_post_b": jnp.zeros((vw,), jnp.float32),
        "proj": _nrm(kvs[3], (vw, embed_dim), std=vw ** -0.5),
    }

    tw = text_cfg["width"]
    kts = jax.random.split(kt, 4 + text_cfg["layers"])
    textp = {
        "tok_emb": _nrm(kts[0], (text_cfg["vocab_size"], tw)),
        "pos_emb": _nrm(kts[1], (text_cfg["context_length"], tw), std=0.01),
        "blocks": [
            _init_block(kts[3 + i], tw, int(tw * text_cfg["mlp_ratio"]))
            for i in range(text_cfg["layers"])
        ],
        "ln_f_g": jnp.ones((tw,), jnp.float32),
        "ln_f_b": jnp.zeros((tw,), jnp.float32),
        "proj": _nrm(kts[2], (tw, embed_dim), std=tw ** -0.5),
    }

    return {
        "visual": visual,
        "text": textp,
        "vision_cfg": vision_cfg,
        "text_cfg": text_cfg,
        "logit_scale": jnp.array(jnp.log(1.0 / 0.07), jnp.float32),
    }


# ----------------------------------------------------------------------------
# Main
# ----------------------------------------------------------------------------

if __name__ == "__main__":
    embed_dim = 16
    vision_cfg = dict(image_size=32, patch_size=16, width=32, heads=2, layers=2,
                      mlp_ratio=4.0)
    text_cfg = dict(context_length=8, vocab_size=64, width=32, heads=2, layers=2,
                    mlp_ratio=4.0)

    key = jax.random.PRNGKey(0)
    k_params, k_img, k_txt = jax.random.split(key, 3)
    params = init_params(k_params, embed_dim, vision_cfg, text_cfg)

    image = jax.random.normal(k_img, (2, 3, 32, 32), jnp.float32)   # NCHW
    text = jax.random.randint(k_txt, (2, 8), 0, text_cfg["vocab_size"], jnp.int32)

    img_feat, txt_feat, logit_scale = custom_text_clip_forward(image, text, params)
    jax.block_until_ready((img_feat, txt_feat, logit_scale))

    assert img_feat.shape == (2, embed_dim)
    assert txt_feat.shape == (2, embed_dim)
    assert jnp.all(jnp.isfinite(img_feat)) and jnp.all(jnp.isfinite(txt_feat))
    assert jnp.isfinite(logit_scale)
    print("KERNEL_OK")
</pallas_src>

<mosaic_0001>
module attributes {stable_mosaic.version = 11 : i64} {
  func.func @_ln_linear_kernel(%arg0: i32, %arg1: i32, %arg2: memref<8x768xbf16, #tpu.memory_space<vmem>>, %arg3: memref<768x32xbf16, #tpu.memory_space<vmem>>, %arg4: memref<8x32xbf16, #tpu.memory_space<vmem>>) attributes {dimension_semantics = [#tpu.dimension_semantics<parallel>, #tpu.dimension_semantics<parallel>], iteration_bounds = array<i64: 1, 1>, scalar_prefetch = 0 : i64, scratch_operands = 0 : i64, tpu.core_type = #tpu.core_type<tc>, window_params = [{transform_indices = @transform_0, window_bounds = array<i64: 8, 768>}, {transform_indices = @transform_1, window_bounds = array<i64: 768, 32>}, {transform_indices = @transform_2, window_bounds = array<i64: 8, 32>}]} {
    %c0 = arith.constant 0 : index
    %c0_0 = arith.constant 0 : index
    %0 = vector.load %arg3[%c0, %c0_0] : memref<768x32xbf16, #tpu.memory_space<vmem>>, vector<768x32xbf16>
    %c0_1 = arith.constant 0 : index
    %c0_2 = arith.constant 0 : index
    %1 = vector.load %arg2[%c0_1, %c0_2] : memref<8x768xbf16, #tpu.memory_space<vmem>>, vector<8x768xbf16>
    %cst = arith.constant dense<0.000000e+00> : vector<8x32xf32>
    %2 = tpu.matmul %1, %0, %cst {dimension_numbers = #tpu.dot_dimension_numbers<[1], [0], [0], [1], [0, 0, 1, 1], [], []>} : vector<8x768xbf16>, vector<768x32xbf16>, vector<8x32xf32> -> vector<8x32xf32>
    %3 = arith.truncf %2 : vector<8x32xf32> to vector<8x32xbf16>
    %c0_3 = arith.constant 0 : index
    %c0_4 = arith.constant 0 : index
    %4 = vector.load %arg4[%c0_3, %c0_4] : memref<8x32xbf16, #tpu.memory_space<vmem>>, vector<8x32xbf16>
    tpu.vector_store %arg4[%c0_3, %c0_4], %3 {strides = array<i32>} : memref<8x32xbf16, #tpu.memory_space<vmem>>, vector<8x32xbf16>,
    return
  }
  func.func @transform_0(%arg0: i32, %arg1: i32) -> (i32, i32) {
    %c0_i32 = arith.constant 0 : i32
    %c0_i32_0 = arith.constant 0 : i32
    return %arg0, %c0_i32 : i32, i32
  }
  func.func @transform_1(%arg0: i32, %arg1: i32) -> (i32, i32) {
    %c0_i32 = arith.constant 0 : i32
    %c0_i32_0 = arith.constant 0 : i32
    return %c0_i32, %arg1 : i32, i32
  }
  func.func @transform_2(%arg0: i32, %arg1: i32) -> (i32, i32) {
    %c0_i32 = arith.constant 0 : i32
    return %arg0, %arg1 : i32, i32
  }
}

</mosaic_0001>

<bundles_post_ra>
// kernel: tpu_custom_call.1
= control target key start
LH: loop header
LB: loop body
LE: loop exit
PB: predicated region body
PF: predicated region fallthrough
CT: control target
= control target key end

     0   :  { %s956_s0 = inlined_call_operand.vmem [shape: bf16[8,768], index: 0, kind: input, shape index: {}]   ;;  %s957_s1 = inlined_call_operand.vmem [shape: bf16[768,32], index: 1, kind: input, shape index: {}]   ;;  %s958_s2 = inlined_call_operand.hbm [shape: bf16[8,32], index: 2, kind: output, shape index: {}]  }
   0x1   :  { %v716_v0 = vld [vmem:[%s957_s1 + $0x38] sm:$0xff]  ;;  %v715_v2 = vld [vmem:[%s957_s1 + $0x30] sm:$0xff]  ;;  %v714_v8 = vld [vmem:[%s957_s1 + $0x28] sm:$0xff] }
   0x2   :  { %v724_v1 = vld [vmem:[%s957_s1 + $0x78] sm:$0xff]  ;;  %420 = vmatpush.bf16.msra.mxu0 %v716_v0  ;;  %v723_v3 = vld [vmem:[%s957_s1 + $0x70] sm:$0xff]  ;;  %v722_v9 = vld [vmem:[%s957_s1 + $0x68] sm:$0xff] }
   0x3   :  { %433 = vmatpush.bf16.msra.mxu1 %v724_v1  ;;  %v732_v4 = vld [vmem:[%s957_s1 + $0xb8] sm:$0xff]  ;;  %v731_v6 = vld [vmem:[%s957_s1 + $0xb0] sm:$0xff]  ;;  %v730_v10 = vld [vmem:[%s957_s1 + $0xa8] sm:$0xff] }
   0x4   :  { %v740_v5 = vld [vmem:[%s957_s1 + $0xf8] sm:$0xff]  ;;  %446 = vmatpush.bf16.msra.mxu2 %v732_v4  ;;  %v739_v7 = vld [vmem:[%s957_s1 + $0xf0] sm:$0xff]  ;;  %v738_v11 = vld [vmem:[%s957_s1 + $0xe8] sm:$0xff] }
   0x5   :  { %459 = vmatpush.bf16.msra.mxu3 %v740_v5  ;;  %v713_v12 = vld [vmem:[%s957_s1 + $0x20] sm:$0xff]  ;;  %v712_v16 = vld [vmem:[%s957_s1 + $0x18] sm:$0xff] }
   0x6   :  { %421 = vmatpush.bf16.msra.mxu0 %v715_v2  ;;  %v721_v13 = vld [vmem:[%s957_s1 + $0x60] sm:$0xff]  ;;  %v720_v17 = vld [vmem:[%s957_s1 + $0x58] sm:$0xff] }
   0x7   :  { %434 = vmatpush.bf16.msra.mxu1 %v723_v3  ;;  %v729_v14 = vld [vmem:[%s957_s1 + $0xa0] sm:$0xff] }
   0x8   :  { %447 = vmatpush.bf16.msra.mxu2 %v731_v6  ;;  %v737_v15 = vld [vmem:[%s957_s1 + $0xe0] sm:$0xff] }
   0x9   :  { %460 = vmatpush.bf16.msra.mxu3 %v739_v7 }
   0xa   :  { %422 = vmatpush.bf16.msra.mxu0 %v714_v8 }
   0xb   :  { %435 = vmatpush.bf16.msra.mxu1 %v722_v9 }
   0xc   :  { %448 = vmatpush.bf16.msra.mxu2 %v730_v10 }
   0xd   :  { %461 = vmatpush.bf16.msra.mxu3 %v738_v11 }
   0xe   :  { %423 = vmatpush.bf16.msra.mxu0 %v713_v12 }
   0xf   :  { %436 = vmatpush.bf16.msra.mxu1 %v721_v13 }
  0x10   :  { %7 = vsyncpa [#allocation3], 0  ;;  %449 = vmatpush.bf16.msra.mxu2 %v729_v14  ;;  %v728_v18 = vld [vmem:[%s957_s1 + $0x98] sm:$0xff]  ;;  %v711_v20 = vld [vmem:[%s957_s1 + $0x10] sm:$0xff]  ;;  %s508_s29 = sshll.u32 %s958_s2, 4  ;;  %vm499_vm0 = vcmask 257024   ;;  %s509_s29 = int_to_ptr.hbm [resolvable:$true] %s508_s29 }
  0x11   :  { %462 = vmatpush.bf16.msra.mxu3 %v737_v15  ;;  %v736_v19 = vld [vmem:[%s957_s1 + $0xd8] sm:$0xff]  ;;  %v719_v21 = vld [vmem:[%s957_s1 + $0x50] sm:$0xff]  ;;  %v710_v24 = vld [vmem:[%s957_s1 + $0x8] sm:$0xff] }
  0x12   :  { %424 = vmatpush.bf16.msra.mxu0 %v712_v16  ;;  %v727_v22 = vld [vmem:[%s957_s1 + $0x90] sm:$0xff]  ;;  %v718_v25 = vld [vmem:[%s957_s1 + $0x48] sm:$0xff]  ;;  %v108_v26 = vld [vmem:[%s956_s0] sm:$0xff] }
  0x13   :  { %437 = vmatpush.bf16.msra.mxu1 %v720_v17  ;;  %v735_v23 = vld [vmem:[%s957_s1 + $0xd0] sm:$0xff]  ;;  %v726_v27 = vld [vmem:[%s957_s1 + $0x88] sm:$0xff]  ;;  %v114_v29 = vunpack.c.l.b16 %v108_v26  ;;  %v115_v30 = vunpack.c.h.b16 %v108_v26  ;;  %v709_v32 = vld [vmem:[%s957_s1] sm:$0xff] }
  0x14   :  { %450 = vmatpush.bf16.msra.mxu2 %v728_v18  ;;  %v734_v28 = vld [vmem:[%s957_s1 + $0xc8] sm:$0xff]  ;;  %v717_v33 = vld [vmem:[%s957_s1 + $0x40] sm:$0xff]  ;;  %v748_v34 = vld [vmem:[%s957_s1 + $0x138] sm:$0xff] }
  0x15   :  { %463 = vmatpush.bf16.msra.mxu3 %v736_v19  ;;  %v109_v31 = vld [vmem:[%s956_s0 + $0x8] sm:$0xff]  ;;  %v756_v35 = vld [vmem:[%s957_s1 + $0x178] sm:$0xff]  ;;  %v725_v36 = vld [vmem:[%s957_s1 + $0x80] sm:$0xff]  ;;  %v120_v40 = vpack.c.b16 %v114_v29, %v114_v29  ;;  %v121_v41 = vpack.c.b16 %v115_v30, %v115_v30 }
  0x16   :  { %425 = vmatpush.bf16.msra.mxu0 %v711_v20  ;;  %v733_v37 = vld [vmem:[%s957_s1 + $0xc0] sm:$0xff]  ;;  %v116_v38 = vunpack.c.l.b16 %v109_v31  ;;  %v117_v39 = vunpack.c.h.b16 %v109_v31  ;;  %v747_v42 = vld [vmem:[%s957_s1 + $0x130] sm:$0xff]  ;;  %v746_v46 = vld [vmem:[%s957_s1 + $0x128] sm:$0xff] }
  0x17   :  { %438 = vmatpush.bf16.msra.mxu1 %v719_v21  ;;  %v755_v43 = vld [vmem:[%s957_s1 + $0x170] sm:$0xff]  ;;  %v754_v47 = vld [vmem:[%s957_s1 + $0x168] sm:$0xff]  ;;  %v745_v48 = vld [vmem:[%s957_s1 + $0x120] sm:$0xff] }
  0x18   :  { %451 = vmatpush.bf16.msra.mxu2 %v727_v22  ;;  %v122_v44 = vpack.c.b16 %v116_v38, %v116_v38  ;;  %v123_v45 = vpack.c.b16 %v117_v39, %v117_v39  ;;  %v753_v49 = vld [vmem:[%s957_s1 + $0x160] sm:$0xff]  ;;  %v744_v50 = vld [vmem:[%s957_s1 + $0x118] sm:$0xff]  ;;  %v743_v52 = vld [vmem:[%s957_s1 + $0x110] sm:$0xff] }
  0x19   :  { %464 = vmatpush.bf16.msra.mxu3 %v735_v23  ;;  %v752_v51 = vld [vmem:[%s957_s1 + $0x158] sm:$0xff]  ;;  %v751_v53 = vld [vmem:[%s957_s1 + $0x150] sm:$0xff]  ;;  %v742_v54 = vld [vmem:[%s957_s1 + $0x108] sm:$0xff] }
  0x1a   :  { %426 = vmatpush.bf16.msra.mxu0 %v710_v24  ;;  %v750_v55 = vld [vmem:[%s957_s1 + $0x148] sm:$0xff]  ;;  %v110_v56 = vld [vmem:[%s956_s0 + $0x10] sm:$0xff]  ;;  %v741_v59 = vld [vmem:[%s957_s1 + $0x100] sm:$0xff]  ;;  %s784_s0 = smov [#allocation2]  }
  0x1b   :  { %439 = vmatpush.bf16.msra.mxu1 %v718_v25  ;;  %v118_v57 = vunpack.c.l.b16 %v110_v56  ;;  %v119_v58 = vunpack.c.h.b16 %v110_v56  ;;  %v749_v60 = vld [vmem:[%s957_s1 + $0x140] sm:$0xff]  ;;  %s506_s1 = sshll.u32 %s784_s0, 4  ;;  %s507_s1 = int_to_ptr.vmem [resolvable:$true] %s506_s1 }
  0x1c   :  { %452 = vmatpush.bf16.msra.mxu2 %v726_v27 }
  0x1d   :  { %465 = vmatpush.bf16.msra.mxu3 %v734_v28  ;;  %v124_v61 = vpack.c.b16 %v118_v57, %v118_v57  ;;  %v125_v62 = vpack.c.b16 %v119_v58, %v119_v58 }
  0x1e   :  { %427 = vmatpush.bf16.msra.mxu0 %v709_v32 }
  0x1f   :  { %440 = vmatpush.bf16.msra.mxu1 %v717_v33 }
  0x20   :  { %453 = vmatpush.bf16.msra.mxu2 %v725_v36 }
  0x21   :  { %466 = vmatpush.bf16.msra.mxu3 %v733_v37  ;;  %428 = vmatmul.bf16.vlgmr.msra.gmra.mxu0 %v120_v40 }
  0x22   :  { %472 = vmatpush.bf16.msrb.mxu0 %v748_v34  ;;  %441 = vmatmul.bf16.vlgmr.msra.gmra.mxu1 %v121_v41 }
  0x23   :  { %485 = vmatpush.bf16.msrb.mxu1 %v756_v35  ;;  %454 = vmatmul.bf16.vlgmr.msra.gmra.mxu2 %v122_v44 }
  0x24   :  { %467 = vmatmul.bf16.vlgmr.msra.gmra.mxu3 %v123_v45 }
  0x26   :  { %473 = vmatpush.bf16.msrb.mxu0 %v747_v42 }
  0x27   :  { %486 = vmatpush.bf16.msrb.mxu1 %v755_v43 }
  0x2a   :  { %474 = vmatpush.bf16.msrb.mxu0 %v746_v46 }
  0x2b   :  { %487 = vmatpush.bf16.msrb.mxu1 %v754_v47 }
  0x2e   :  { %475 = vmatpush.bf16.msrb.mxu0 %v745_v48 }
  0x2f   :  { %488 = vmatpush.bf16.msrb.mxu1 %v753_v49 }
  0x32   :  { %476 = vmatpush.bf16.msrb.mxu0 %v744_v50 }
  0x33   :  { %489 = vmatpush.bf16.msrb.mxu1 %v752_v51 }
  0x36   :  { %477 = vmatpush.bf16.msrb.mxu0 %v743_v52 }
  0x37   :  { %490 = vmatpush.bf16.msrb.mxu1 %v751_v53 }
  0x3a   :  { %478 = vmatpush.bf16.msrb.mxu0 %v742_v54 }
  0x3b   :  { %491 = vmatpush.bf16.msrb.mxu1 %v750_v55 }
  0x3e   :  { %479 = vmatpush.bf16.msrb.mxu0 %v741_v59 }
  0x3f   :  { %492 = vmatpush.bf16.msrb.mxu1 %v749_v60 }
  0x41   :  { %480 = vmatmul.bf16.vlgmr.msrb.gmra.mxu0 %v124_v61 }
  0x42   :  { %493 = vmatmul.bf16.vlgmr.msrb.gmra.mxu1 %v125_v62 }
  0x9e   :  { %v429_v63 = vpop.f32.mrf.mxu0 }
  0x9f   :  { %v442_v0 = vpop.f32.mrf.mxu1 }
  0xa0   :  { %v443_v7 = vadd.f32 %v442_v0, %v429_v63 }
  0xa6   :  { %v431_v1 = vpop.f32.mrf.mxu0  ;;  %v455_v3 = vpop.f32.mrf.mxu2 }
  0xa7   :  { %v444_v2 = vpop.f32.mrf.mxu1  ;;  %v468_v4 = vpop.f32.mrf.mxu3  ;;  %v456_v8 = vadd.f32 %v455_v3, %v443_v7 }
  0xa9   :  { %v469_v9 = vadd.f32 %v468_v4, %v456_v8 }
  0xae   :  { %v457_v5 = vpop.f32.mrf.mxu2 }
  0xaf   :  { %v470_v6 = vpop.f32.mrf.mxu3 }
  0xbe   :  { %v481_v10 = vpop.f32.mrf.mxu0 }
  0xbf   :  { %v494_v11 = vpop.f32.mrf.mxu1  ;;  %v482_v12 = vadd.f32 %v481_v10, %v469_v9 }
  0xc1   :  { %v495_v13 = vadd.f32 %v494_v11, %v482_v12 }
  0xc3   :  { %v498_v14 = vpack.c.bf16 %v495_v13, %v495_v13 }
  0xc5   :  { %500 = vst.msk [vmem:[#allocation2] sm:$0xf] %vm499_vm0, %v498_v14 }
  0xc6   :  { %v483_v15 = vpop.f32.mrf.mxu0  ;;  %511 = dma.vmem_to_hbm [thread:$0]  %s507_s1, 64, %s509_s29, [#allocation3]  }
  0xc7   :  { %v496_v16 = vpop.f32.mrf.mxu1 }
  0xc8   :  { %782 = dma.done.wait [#allocation3], 64  }
  0xc9   :  { %783 = vsyncadd [#allocation3], 4294967232 }
  0xca   :  { %516 = vsyncpa [#allocation3], 1 }

</bundles_post_ra>
